<compile_context>
chip_gen: v7x
topology: tpu7x:2x2x1
jax: 0.10.0
libtpu: 0.0.40
codegen_flags: <defaults>
</compile_context>

<pallas_src>
import functools

import jax
import jax.numpy as jnp
from jax.experimental import pallas as pl
from jax.experimental.pallas import tpu as pltpu

_MIB = 1024 * 1024


def _base_model_kernel(x_ref, w_ref, b_ref, o_ref, acc_ref, *, inv_seq_len):
    """Fused mean-pool (over sequence) + linear projection + bias.

    Grid: (B_tiles, S_tiles); S is the inner reduction axis.
      x_ref:   (TB, TS, D) VMEM  -- current (batch-tile, seq-chunk)
      w_ref:   (D, O)      VMEM  -- resident across all grid steps
      b_ref:   (1, O)      VMEM  -- resident
      o_ref:   (TB, O)     VMEM  -- same block across S (written on last step)
      acc_ref: (TB, D) f32 scratch -- running sum over the sequence
    """
    s = pl.program_id(1)

    @pl.when(s == 0)
    def _():
        acc_ref[...] = jnp.zeros_like(acc_ref)

    # Accumulate the per-chunk sum directly in f32 (no full-tile f32 copy).
    acc_ref[...] += jnp.sum(x_ref[...], axis=1, dtype=jnp.float32)

    @pl.when(s == pl.num_programs(1) - 1)
    def _():
        pooled = acc_ref[...] * inv_seq_len                       # (TB, D) mean
        # Native-dtype MXU matmul (no f32 copy of W), f32 accumulation.
        y = jnp.dot(pooled.astype(w_ref.dtype), w_ref[...],
                    preferred_element_type=jnp.float32)           # (TB, O)
        y = y + b_ref[...].astype(jnp.float32)                    # bcast (1, O)
        o_ref[...] = y.astype(o_ref.dtype)


# ----------------------------------------------------------------------------
# Tiling heuristics
# ----------------------------------------------------------------------------
def _pick_tile(total, cap, align):
    """Largest divisor of `total` that is <= cap and a multiple of `align`.

    Returns None if no such divisor exists (caller decides the fallback).
    """
    cap = min(cap, total)
    if cap < align:
        return None
    best = None
    t = align
    while t <= cap:
        if total % t == 0:
            best = t
        t += align
    return best


def _padded_bytes(rows, cols, itemsize, sub=8, lane=128):
    """VMEM footprint of a 2-D tile after (sublane, lane) padding."""
    return ((rows + sub - 1) // sub * sub) * ((cols + lane - 1) // lane * lane) * itemsize


def _device_kind():
    try:
        return jax.devices()[0].device_kind.lower()
    except Exception:  # pragma: no cover - defensive
        return ""


def _default_block_bytes(kind):
    """Per-generation x-block byte target (amortizes ~0.35us/step overhead)."""
    if "v7" in kind:
        return 10 * _MIB          # 3.2 TB/s HBM -> need big chunks
    if "v6" in kind:
        return 8 * _MIB
    if "v5" in kind:
        return 5 * _MIB
    return 6 * _MIB


def _vmem_capacity_bytes():
    try:
        return int(pltpu.get_tpu_info().vmem_capacity_bytes)
    except Exception:  # pragma: no cover - defensive
        return 64 * _MIB          # conservative: v7x physical VMEM per TC


def base_model_forward(x, w, b, *, target_block_bytes=None):
    """Pallas wrapper: x (B,S,D), w (D,O), b (O,) -> (B,O)."""
    B, S, D = x.shape
    O = w.shape[1]
    b2d = b.reshape(1, O)

    kind = _device_kind()
    is_v7x = "v7" in kind
    if target_block_bytes is None:
        target_block_bytes = _default_block_bytes(kind)

    itemsize = jnp.dtype(x.dtype).itemsize
    # Dtype-aware sublane alignment: f32 -> 8, bf16 -> 16, int8/fp8 -> 32.
    align_s = 8 * max(1, 4 // itemsize)
    row_bytes = D * itemsize

    # ---- Batch tile ---------------------------------------------------------
    tb_cap = 256
    if is_v7x and B >= 16:
        # Guarantee >= 2 batch blocks so the "parallel" axis shards across
        # both TensorCores (no-op on single-TC v5e/v6e).
        tb_cap = min(tb_cap, max(8, (B // 2) // 8 * 8))
    # Bound TB so a minimum-height sequence chunk (align_s rows) still fits
    # the per-block byte budget (keeps the pipelined reduction alive).
    tb_budget = target_block_bytes // max(1, align_s * row_bytes)
    if tb_budget >= 8:
        tb_cap = min(tb_cap, (tb_budget // 8) * 8)
    TB = _pick_tile(B, tb_cap, 8)
    if TB is None:
        TB = B  # full-extent block is always layout-legal

    # ---- Fixed (non-pipelined-x) VMEM footprint -----------------------------
    fixed_bytes = (
        _padded_bytes(TB, D, 4)                                  # f32 acc scratch
        + 2 * _padded_bytes(D, O, jnp.dtype(w.dtype).itemsize)   # W (buffered)
        + 2 * _padded_bytes(1, O, jnp.dtype(b2d.dtype).itemsize) # bias
        + 2 * _padded_bytes(TB, O, itemsize)                     # out block
    )

    vmem_capacity = _vmem_capacity_bytes()
    safe_vmem = max(16 * _MIB, min(vmem_capacity - 12 * _MIB, 112 * _MIB))

    # ---- Sequence chunk ------------------------------------------------------
    safe_block_bytes = min(target_block_bytes,
                           max(align_s * row_bytes, (safe_vmem - fixed_bytes) // 2))
    ts_cap = max(align_s, safe_block_bytes // max(1, TB * row_bytes))
    TS = _pick_tile(S, ts_cap, align_s)
    if TS is None:
        TS = _pick_tile(S, ts_cap, 8)   # 8-aligned is still layout-legal
    if TS is None:
        TS = S                          # full extent (legal for any S)

    # Per-chunk VMEM footprint (double-buffered by the pipeline).
    block_bytes = TB * _padded_bytes(TS, D, itemsize)
    vmem_need = 2 * block_bytes + fixed_bytes
    if vmem_need > safe_vmem:
        raise ValueError(
            f"BaseModel Pallas kernel: x block ({TB},{TS},{D}) needs "
            f"{vmem_need / _MIB:.1f} MiB VMEM (> {safe_vmem / _MIB:.1f} MiB budget); "
            f"shapes (B={B}, S={S}, D={D}) have no sufficiently small aligned "
            f"sequence tile.")

    vmem_limit = int(min(max(vmem_need + 8 * _MIB, 32 * _MIB), vmem_capacity))

    grid = (B // TB, S // TS)

    flops = B * S * D + 2 * B * D * O + B * O
    bytes_accessed = (x.size * itemsize
                      + w.size * jnp.dtype(w.dtype).itemsize
                      + b2d.size * jnp.dtype(b2d.dtype).itemsize
                      + B * O * itemsize)
    cost = pl.CostEstimate(flops=flops, transcendentals=0,
                           bytes_accessed=bytes_accessed)

    kernel = functools.partial(_base_model_kernel, inv_seq_len=1.0 / S)

    return pl.pallas_call(
        kernel,
        out_shape=jax.ShapeDtypeStruct((B, O), x.dtype),
        grid_spec=pltpu.PrefetchScalarGridSpec(
            num_scalar_prefetch=0,
            grid=grid,
            in_specs=[
                pl.BlockSpec((TB, TS, D), lambda bi, si: (bi, si, 0)),
                pl.BlockSpec((D, O), lambda bi, si: (0, 0)),
                pl.BlockSpec((1, O), lambda bi, si: (0, 0)),
            ],
            out_specs=pl.BlockSpec((TB, O), lambda bi, si: (bi, 0)),
            scratch_shapes=[pltpu.VMEM((TB, D), jnp.float32)],
        ),
        compiler_params=pltpu.CompilerParams(
            dimension_semantics=("parallel", "arbitrary"),
            vmem_limit_bytes=vmem_limit,
        ),
        cost_estimate=cost,
    )(x, w, b2d)


def _reference_forward(x, w, b):
    pooled = jnp.mean(x.astype(jnp.float32), axis=1)
    return (pooled @ w.astype(jnp.float32) + b.astype(jnp.float32)).astype(x.dtype)


if __name__ == "__main__":
    key = jax.random.PRNGKey(0)

    # --- Check 1: small shapes matching the forward contract --------------
    # batch=2, sequence_length=8, input_dim=32, output_dim=1
    batch, seq, input_dim, output_dim = 2, 8, 32, 1
    kx, kw, kb = jax.random.split(key, 3)
    x = jax.random.normal(kx, (batch, seq, input_dim), dtype=jnp.float32)
    w = jax.random.normal(kw, (input_dim, output_dim), dtype=jnp.float32) * (
        1.0 / jnp.sqrt(input_dim)
    )
    b = jax.random.normal(kb, (output_dim,), dtype=jnp.float32) * 0.01

    out = jax.block_until_ready(base_model_forward(x, w, b))
    ref = _reference_forward(x, w, b)
    assert out.shape == (batch, output_dim), out.shape
    assert jnp.allclose(out, ref, atol=1e-5, rtol=1e-5), (out, ref)

    # --- Check 2: exercise the multi-step pipelined sequence reduction ----
    # (small target_block_bytes forces grid=(1, S//8) so the accumulator /
    #  @pl.when init+finalize path actually runs across several grid steps)
    batch2, seq2, input_dim2, output_dim2 = 16, 64, 128, 1
    kx2, kw2, kb2 = jax.random.split(jax.random.PRNGKey(1), 3)
    x2 = jax.random.normal(kx2, (batch2, seq2, input_dim2), dtype=jnp.float32)
    w2 = jax.random.normal(kw2, (input_dim2, output_dim2), dtype=jnp.float32) * (
        1.0 / jnp.sqrt(input_dim2)
    )
    b2 = jax.random.normal(kb2, (output_dim2,), dtype=jnp.float32) * 0.01

    out2 = jax.block_until_ready(
        base_model_forward(x2, w2, b2,
                           target_block_bytes=batch2 * input_dim2 * 4 * 8)
    )
    ref2 = _reference_forward(x2, w2, b2)
    assert out2.shape == (batch2, output_dim2), out2.shape
    assert jnp.allclose(out2, ref2, atol=1e-4, rtol=1e-4), (out2, ref2)

    print("KERNEL_OK")
</pallas_src>

<mosaic_0001>
module attributes {stable_mosaic.version = 11 : i64} {
  func.func @_base_model_kernel(%arg0: i32, %arg1: i32, %arg2: memref<2x8x32xf32, #tpu.memory_space<vmem>>, %arg3: memref<32x1xf32, #tpu.memory_space<vmem>>, %arg4: memref<1x1xf32, #tpu.memory_space<vmem>>, %arg5: memref<2x1xf32, #tpu.memory_space<vmem>>, %arg6: memref<2x32xf32, #tpu.memory_space<vmem>>) attributes {dimension_semantics = [#tpu.dimension_semantics<parallel>, #tpu.dimension_semantics<arbitrary>], iteration_bounds = array<i64: 1, 1>, scalar_prefetch = 0 : i64, scratch_operands = 1 : i64, tpu.core_type = #tpu.core_type<tc>, window_params = [{transform_indices = @transform_0, window_bounds = array<i64: 2, 8, 32>}, {pipeline_mode = #tpu.pipeline_mode<synchronous>, transform_indices = @transform_1, window_bounds = array<i64: 32, 1>}, {pipeline_mode = #tpu.pipeline_mode<synchronous>, transform_indices = @transform_2, window_bounds = array<i64: 1, 1>}, {transform_indices = @transform_3, window_bounds = array<i64: 2, 1>}]} {
    %c0_i32 = arith.constant 0 : i32
    %0 = arith.cmpi eq, %arg1, %c0_i32 : i32
    %1 = arith.extui %0 : i1 to i32
    %c0_i32_0 = arith.constant 0 : i32
    %2 = arith.cmpi ne, %1, %c0_i32_0 : i32
    scf.if %2 {
      %cst_9 = arith.constant 0.000000e+00 : f32
      %11 = vector.broadcast %cst_9 : f32 to vector<2x32xf32>
      %c0_10 = arith.constant 0 : index
      %c0_11 = arith.constant 0 : index
      %12 = vector.load %arg6[%c0_10, %c0_11] : memref<2x32xf32, #tpu.memory_space<vmem>>, vector<2x32xf32>
      tpu.vector_store %arg6[%c0_10, %c0_11], %11 {strides = array<i32>} : memref<2x32xf32, #tpu.memory_space<vmem>>, vector<2x32xf32>,
    } else {
    }
    %c0 = arith.constant 0 : index
    %c0_1 = arith.constant 0 : index
    %3 = vector.load %arg6[%c0, %c0_1] : memref<2x32xf32, #tpu.memory_space<vmem>>, vector<2x32xf32>
    %c0_2 = arith.constant 0 : index
    %c0_3 = arith.constant 0 : index
    %c0_4 = arith.constant 0 : index
    %4 = vector.load %arg2[%c0_2, %c0_3, %c0_4] : memref<2x8x32xf32, #tpu.memory_space<vmem>>, vector<2x8x32xf32>
    %cst = arith.constant dense<0.000000e+00> : vector<2x32xf32>
    %5 = vector.multi_reduction <add>, %4, %cst [1] : vector<2x8x32xf32> to vector<2x32xf32>
    %6 = arith.addf %3, %5 : vector<2x32xf32>
    %c0_5 = arith.constant 0 : index
    %c0_6 = arith.constant 0 : index
    %7 = vector.load %arg6[%c0_5, %c0_6] : memref<2x32xf32, #tpu.memory_space<vmem>>, vector<2x32xf32>
    tpu.vector_store %arg6[%c0_5, %c0_6], %6 {strides = array<i32>} : memref<2x32xf32, #tpu.memory_space<vmem>>, vector<2x32xf32>,
    %c0_i32_7 = arith.constant 0 : i32
    %8 = arith.cmpi eq, %arg1, %c0_i32_7 : i32
    %9 = arith.extui %8 : i1 to i32
    %c0_i32_8 = arith.constant 0 : i32
    %10 = arith.cmpi ne, %9, %c0_i32_8 : i32
    scf.if %10 {
      %c0_9 = arith.constant 0 : index
      %c0_10 = arith.constant 0 : index
      %11 = vector.load %arg6[%c0_9, %c0_10] : memref<2x32xf32, #tpu.memory_space<vmem>>, vector<2x32xf32>
      %cst_11 = arith.constant 1.250000e-01 : f32
      %12 = vector.broadcast %cst_11 : f32 to vector<2x32xf32>
      %13 = arith.mulf %11, %12 : vector<2x32xf32>
      %c0_12 = arith.constant 0 : index
      %c0_13 = arith.constant 0 : index
      %14 = vector.load %arg3[%c0_12, %c0_13] : memref<32x1xf32, #tpu.memory_space<vmem>>, vector<32x1xf32>
      %cst_14 = arith.constant dense<0.000000e+00> : vector<2x1xf32>
      %15 = tpu.matmul %13, %14, %cst_14 {dimension_numbers = #tpu.dot_dimension_numbers<[1], [0], [0], [1], [0, 0, 1, 1], [], []>} : vector<2x32xf32>, vector<32x1xf32>, vector<2x1xf32> -> vector<2x1xf32>
      %c0_15 = arith.constant 0 : index
      %c0_16 = arith.constant 0 : index
      %16 = vector.load %arg4[%c0_15, %c0_16] : memref<1x1xf32, #tpu.memory_space<vmem>>, vector<1x1xf32>
      %17 = vector.broadcast %16 : vector<1x1xf32> to vector<2x1xf32>
      %18 = arith.addf %15, %17 : vector<2x1xf32>
      %c0_17 = arith.constant 0 : index
      %c0_18 = arith.constant 0 : index
      %19 = vector.load %arg5[%c0_17, %c0_18] : memref<2x1xf32, #tpu.memory_space<vmem>>, vector<2x1xf32>
      tpu.vector_store %arg5[%c0_17, %c0_18], %18 {strides = array<i32>} : memref<2x1xf32, #tpu.memory_space<vmem>>, vector<2x1xf32>,
    } else {
    }
    return
  }
  func.func @transform_0(%arg0: i32, %arg1: i32) -> (i32, i32, i32) {
    %c0_i32 = arith.constant 0 : i32
    %c0_i32_0 = arith.constant 0 : i32
    return %arg0, %arg1, %c0_i32 : i32, i32, i32
  }
  func.func @transform_1(%arg0: i32, %arg1: i32) -> (i32, i32) {
    %c0_i32 = arith.constant 0 : i32
    %c0_i32_0 = arith.constant 0 : i32
    %c0_i32_1 = arith.constant 0 : i32
    return %c0_i32, %c0_i32_0 : i32, i32
  }
  func.func @transform_2(%arg0: i32, %arg1: i32) -> (i32, i32) {
    %c0_i32 = arith.constant 0 : i32
    %c0_i32_0 = arith.constant 0 : i32
    %c0_i32_1 = arith.constant 0 : i32
    return %c0_i32, %c0_i32_0 : i32, i32
  }
  func.func @transform_3(%arg0: i32, %arg1: i32) -> (i32, i32) {
    %c0_i32 = arith.constant 0 : i32
    %c0_i32_0 = arith.constant 0 : i32
    return %arg0, %c0_i32 : i32, i32
  }
}

</mosaic_0001>

<bundles_post_ra>
// kernel: tpu_custom_call.1
= control target key start
LH: loop header
LB: loop body
LE: loop exit
PB: predicated region body
PF: predicated region fallthrough
CT: control target
= control target key end

     0   :  { %vm20_vm0 = vcmask 254976   ;;  %v170_v0 = vmov 0.0|0.0   ;;  %v171_v4 = vmov 0.0   ;;  %vm172_vm1 = vmmov 0   ;;  %s222_s1 = inlined_call_operand.vmem [shape: f32[32,1], index: 1, kind: input, shape index: {}]   ;;  %s223_s0 = inlined_call_operand.vmem [shape: f32[2,8,32], index: 0, kind: input, shape index: {}]   ;;  %s224_s2 = inlined_call_operand.<no memory space> [shape: f32[1,1], index: 2, kind: input, shape index: {}]   ;;  %s225_s3 = inlined_call_operand.vmem [shape: f32[2,1], index: 3, kind: output, shape index: {}]  }
   0x1   :  { %161 = vmatprep.subr.bf16.mxu0 %v170_v0  ;;  %v53_v1 = vld [vmem:[%s222_s1] sm:$0xff]  ;;  %v54_v2 = vld [vmem:[%s222_s1 + $0x8] sm:$0xff]  ;;  %v55_v3 = vld [vmem:[%s222_s1 + $0x10] sm:$0xff]  ;;  %21 = vst.msk [vmem:[#allocation2] sm:$0x3] %vm20_vm0, %v171_v4  ;;  %158 = vmatprep.mubr.msk.f32.mxu0 %vm172_vm1, %v171_v4  ;;  %vm25_vm2 = vcmask 261120   ;;  %v8_v5 = vstv %s224_s2 }
   0x2   :  { %v162_v6 = vpack.c.bf16 %v54_v2, %v53_v1  ;;  %v56_v7 = vld [vmem:[%s222_s1 + $0x18] sm:$0xff]  ;;  %v23_v8 = vld [vmem:[%s223_s0] sm:$0xff]  ;;  %v24_v9 = vld [vmem:[%s223_s0 + $0x8] sm:$0xff]  ;;  %9 = vst [vmem:[#allocation3] sm:$0x1] %v8_v5  ;;  %vm42_vm3 = vcmask 1041409  }
   0x3   :  { %v26_v10 = vsel %vm25_vm2, %v23_v8, 0.0  ;;  %v33_v11 = vsel %vm25_vm2, %v24_v9, 0.0  ;;  %v165_v12 = vpack.c.bf16 %v56_v7, %v55_v3  ;;  %vm137_vm4 = vcmask 1024  }
   0x4   :  { %163 = vmatpush3.bf16.msra.mxu0 %v162_v6  ;;  %v27_v13 = vrot.slane %v26_v10, 4  ;;  %v34_v14 = vrot.slane %v33_v11, 4 }
   0x5   :  { %164 = vmatprep.subr.bf16.mxu0 %v170_v0 }
   0x6   :  { %v28_v15 = vadd.f32 %v27_v13, %v26_v10  ;;  %v35_v16 = vadd.f32 %v34_v14, %v33_v11 }
   0x8   :  { %166 = vmatpush3.bf16.msra.mxu0 %v165_v12  ;;  %v29_v17 = vrot.slane %v28_v15, 2  ;;  %v36_v18 = vrot.slane %v35_v16, 2  ;;  %v22_v23 = vld [vmem:[#allocation2] sm:$0x3] }
   0x9   :  { %v143_v30 = vld [vmem:[#allocation3] ss:$0 sm:$0xff] }
   0xa   :  { %v30_v19 = vadd.f32 %v29_v17, %v28_v15  ;;  %v37_v20 = vadd.f32 %v36_v18, %v35_v16 }
   0xc   :  { %v31_v21 = vrot.slane %v30_v19, 1  ;;  %v38_v22 = vrot.slane %v37_v20, 1 }
   0xe   :  { %v32_v24 = vadd.f32 %v31_v21, %v30_v19  ;;  %v39_v25 = vadd.f32 %v38_v22, %v37_v20 }
  0x10   :  { %v43_v26 = vsel %vm42_vm3, %v39_v25, %v32_v24 }
  0x11   :  { %v45_v27 = vadd.f32 %v43_v26, %v22_v23 }
  0x13   :  { %47 = vst.msk [vmem:[#allocation2] sm:$0x3] %vm20_vm0, %v45_v27 }
  0x1a   :  { %v51_v28 = vld [vmem:[#allocation2] sm:$0x3] }
  0x1b   :  { %v52_v29 = vmul.f32 0.125, %v51_v28 }
  0x1d   :  { %159 = vmatmul.mubr.msk.f32.vlgmr.msra.gmra.mrb[0].mxu0 %vm25_vm2, %v52_v29 }
  0xf0   :  { %v133_v31 = vpop.f32.mrb[0].mxu0 }
  0xf1   :  { %v134_v32 = vadd.f32 %v143_v30, %v133_v31  ;;  %v160_v33 = vpop.f32.mrb[1].mxu0 }
  0xf3   :  { %138 = vst.msk [vmem:[%s225_s3] sm:$0x3] %vm137_vm4, %v134_v32 }

</bundles_post_ra>
